<compile_context>
chip_gen: v5e
topology: v5e:2x2
jax: 0.10.0
libtpu: 0.0.40
codegen_flags: <defaults>
</compile_context>

<pallas_src>
import jax
import jax.numpy as jnp
from jax import lax
from jax.experimental import pallas as pl
from jax.experimental.pallas import tpu as pltpu


# ---------- single-step kernel: whole problem resident in VMEM ---------------
def _mlp_kernel_resident(x_ref, w_ref, b_ref, o_ref):
    # x: (B, F), w: (O, F) -> contract on F (no transpose materialized).
    y = lax.dot_general(
        x_ref[...],
        w_ref[...],
        dimension_numbers=(((1,), (1,)), ((), ())),
        preferred_element_type=jnp.float32,
    )
    o_ref[...] = (y + b_ref[...]).astype(o_ref.dtype)


# ---------- K-tiled fallback for large feature dims ---------------------------
def _mlp_kernel_tiled(x_ref, w_ref, b_ref, o_ref, acc_ref):
    k = pl.program_id(0)

    @pl.when(k == 0)
    def _():
        acc_ref[...] = jnp.zeros_like(acc_ref)

    acc_ref[...] += lax.dot_general(
        x_ref[...],
        w_ref[...],
        dimension_numbers=(((1,), (1,)), ((), ())),
        preferred_element_type=jnp.float32,
    )

    @pl.when(k == pl.num_programs(0) - 1)
    def _():
        o_ref[...] = (acc_ref[...] + b_ref[...]).astype(o_ref.dtype)


def video_segment_mlp(x, weight, bias, *, tk=512,
                      vmem_budget_bytes=16 * 1024 * 1024):
    """Forward of VideoSegmentMlp.

    x:      (B, ...) any trailing dims; flattened like torch.nn.Flatten.
    weight: (O, F) PyTorch nn.Linear layout (used as-is, no transpose copy).
    bias:   (O,)
    """
    B = x.shape[0]
    F = 1
    for d in x.shape[1:]:
        F *= d
    O, Fw = weight.shape
    assert Fw == F, "weight feature dim must match flattened input"

    x2d = x.reshape(B, F)
    b2d = bias.reshape(1, O)

    nbytes = (x2d.size * x2d.dtype.itemsize
              + weight.size * weight.dtype.itemsize
              + b2d.size * b2d.dtype.itemsize
              + B * O * x2d.dtype.itemsize)

    if nbytes <= vmem_budget_bytes:
        # Entire problem fits in VMEM on every generation (v5e/v6e/v7x):
        # one resident block, zero grid/pipeline overhead, no scratch.
        return pl.pallas_call(
            _mlp_kernel_resident,
            out_shape=jax.ShapeDtypeStruct((B, O), x.dtype),
            in_specs=[
                pl.BlockSpec(memory_space=pltpu.MemorySpace.VMEM),  # x
                pl.BlockSpec(memory_space=pltpu.MemorySpace.VMEM),  # weight (O,F)
                pl.BlockSpec(memory_space=pltpu.MemorySpace.VMEM),  # bias (1,O)
            ],
            out_specs=pl.BlockSpec(memory_space=pltpu.MemorySpace.VMEM),
        )(x2d, weight, b2d)

    # Large-F fallback: tile the reduction axis (trailing, "arbitrary"),
    # keep weight in (O, F) layout so the (O, tk) tile is lane-dense,
    # pad F to a tile multiple instead of asserting divisibility.
    F_pad = pl.cdiv(F, tk) * tk
    if F_pad != F:
        x2d = jnp.pad(x2d, ((0, 0), (0, F_pad - F)))
        weight = jnp.pad(weight, ((0, 0), (0, F_pad - F)))

    grid = (F_pad // tk,)
    return pl.pallas_call(
        _mlp_kernel_tiled,
        out_shape=jax.ShapeDtypeStruct((B, O), x.dtype),
        grid_spec=pltpu.PrefetchScalarGridSpec(
            num_scalar_prefetch=0,
            grid=grid,
            in_specs=[
                pl.BlockSpec((B, tk), lambda k: (0, k)),   # x tile
                pl.BlockSpec((O, tk), lambda k: (0, k)),   # weight tile (lane-dense)
                pl.BlockSpec((1, O), lambda k: (0, 0)),    # bias (resident)
            ],
            out_specs=pl.BlockSpec((B, O), lambda k: (0, 0)),
            scratch_shapes=[pltpu.VMEM((B, O), jnp.float32)],
        ),
        compiler_params=pltpu.CompilerParams(
            dimension_semantics=("arbitrary",),
        ),
    )(x2d, weight, b2d)


if __name__ == "__main__":
    key = jax.random.PRNGKey(0)
    kx, kw, kb = jax.random.split(key, 3)

    # Small shapes consistent with the module: video-segment feature map.
    B, C, H, W = 2, 4, 16, 16          # F = 4*16*16 = 1024
    OUT = 32                           # output_size

    x = jax.random.normal(kx, (B, C, H, W), dtype=jnp.float32)

    F = C * H * W
    # Deterministic synthetic init (LazyLinear would be kaiming-uniform; plain
    # scaled normals are fine for a synthetic correctness check).
    weight = jax.random.normal(kw, (OUT, F), dtype=jnp.float32) * (1.0 / F**0.5)
    bias = jax.random.normal(kb, (OUT,), dtype=jnp.float32) * 0.01

    y = video_segment_mlp(x, weight, bias)
    y = jax.block_until_ready(y)

    # Reference check against plain JAX (same math as torch Linear).
    y_ref = x.reshape(B, F) @ weight.T + bias
    assert y.shape == (B, OUT)
    assert jnp.allclose(y, y_ref, atol=1e-4, rtol=1e-4)

    print("KERNEL_OK")
</pallas_src>

<mosaic_0001>
module attributes {stable_mosaic.version = 11 : i64} {
  func.func @_mlp_kernel_resident(%arg0: memref<2x1024xf32, #tpu.memory_space<vmem>>, %arg1: memref<32x1024xf32, #tpu.memory_space<vmem>>, %arg2: memref<1x32xf32, #tpu.memory_space<vmem>>, %arg3: memref<2x32xf32, #tpu.memory_space<vmem>>) attributes {dimension_semantics = [], scalar_prefetch = 0 : i64, scratch_operands = 0 : i64, tpu.core_type = #tpu.core_type<tc>} {
    %c0 = arith.constant 0 : index
    %c0_0 = arith.constant 0 : index
    %0 = vector.load %arg0[%c0, %c0_0] : memref<2x1024xf32, #tpu.memory_space<vmem>>, vector<2x1024xf32>
    %c0_1 = arith.constant 0 : index
    %c0_2 = arith.constant 0 : index
    %1 = vector.load %arg1[%c0_1, %c0_2] : memref<32x1024xf32, #tpu.memory_space<vmem>>, vector<32x1024xf32>
    %cst = arith.constant dense<0.000000e+00> : vector<2x32xf32>
    %2 = tpu.matmul %0, %1, %cst {dimension_numbers = #tpu.dot_dimension_numbers<[1], [1], [0], [0], [0, 0, 1, 0], [], []>} : vector<2x1024xf32>, vector<32x1024xf32>, vector<2x32xf32> -> vector<2x32xf32>
    %c0_3 = arith.constant 0 : index
    %c0_4 = arith.constant 0 : index
    %3 = vector.load %arg2[%c0_3, %c0_4] : memref<1x32xf32, #tpu.memory_space<vmem>>, vector<1x32xf32>
    %4 = vector.broadcast %3 : vector<1x32xf32> to vector<2x32xf32>
    %5 = arith.addf %2, %4 : vector<2x32xf32>
    %c0_5 = arith.constant 0 : index
    %c0_6 = arith.constant 0 : index
    %6 = vector.load %arg3[%c0_5, %c0_6] : memref<2x32xf32, #tpu.memory_space<vmem>>, vector<2x32xf32>
    tpu.vector_store %arg3[%c0_5, %c0_6], %5 {strides = array<i32>} : memref<2x32xf32, #tpu.memory_space<vmem>>, vector<2x32xf32>,
    return
  }
}

</mosaic_0001>

<bundles_post_ra>
// kernel: tpu_custom_call.1
= control target key start
LH: loop header
LB: loop body
LE: loop exit
PB: predicated region body
PF: predicated region fallthrough
CT: control target
= control target key end

     0   :  { %8 = vsyncpa [#allocation3], 0  ;;  %s405_s0 = inlined_call_operand.hbm [shape: f32[2,1024], index: 0, kind: input, shape index: {}]   ;;  %s406_s1 = inlined_call_operand.hbm [shape: f32[32,1024], index: 1, kind: input, shape index: {}]   ;;  %s407_s2 = inlined_call_operand.vmem [shape: f32[1,32], index: 2, kind: input, shape index: {}]   ;;  %s408_s3 = inlined_call_operand.hbm [shape: f32[2,32], index: 3, kind: output, shape index: {}]  }
   0x1   :  { %9 = vsyncpa [#allocation6], 0 }
   0x2   :  { %10 = vsyncpa [#allocation4], 0  ;;  %s16_s14 = sshll.u32 %s405_s0, 4  ;;  %s368_s15 = smov [#allocation2]   ;;  %s17_s14 = int_to_ptr.hbm [resolvable:$true] %s16_s14 }
   0x3   :  { %s18_s16 = sshll.u32 %s368_s15, 4  ;;  %s26_s19 = sshll.u32 %s406_s1, 4  ;;  %s19_s16 = int_to_ptr.vmem [resolvable:$true] %s18_s16  ;;  %s27_s19 = int_to_ptr.hbm [resolvable:$true] %s26_s19 }
   0x4   :  { %21 = dma.hbm_to_vmem [thread:$0]  %s17_s14, 256, %s19_s16, [#allocation3]  }
   0x5   :  { %s369_s20 = smov [#allocation5]   ;;  %s370_s22 = smov 1024  }
   0x6   :  { %s28_s21 = sshll.u32 %s369_s20, 4  ;;  %s371_s23 = smov 64   ;;  %s29_s21 = int_to_ptr.vmem [resolvable:$true] %s28_s21 }
   0x7   :  { %34 = dma.hbm_to_vmem [thread:$0]  %s27_s19, 4096, %s29_s21, [#allocation6], %s370_s22, %s370_s22, %s371_s23  }
   0x8   :  { %362 = dma.done.wait [#allocation3], 256  }
   0x9   :  { %363 = vsyncadd [#allocation3], 4294967040 }
   0xa   :  { %364 = dma.done.wait [#allocation6], 4096  }
   0xb   :  { %365 = vsyncadd [#allocation6], 4294963200  ;;  %v73_v0 = vld [vmem:[#allocation5 + $0xd0] sm:$0xff]  ;;  %v71_v1 = vld [vmem:[#allocation5 + $0xc0] sm:$0xff]  ;;  %s372_s24 = smov [#allocation7]   ;;  %s273_s28 = sshll.u32 %s408_s3, 4  ;;  %s274_s28 = int_to_ptr.hbm [resolvable:$true] %s273_s28 }
   0xc   :  { %v74_v2 = vld [vmem:[#allocation5 + $0xd8] sm:$0xff]  ;;  %156 = vmatpush.xpose.msra.mxu2 %v73_v0  ;;  %116 = vmatpush.xpose.msra.mxu0 %v71_v1  ;;  %v72_v3 = vld [vmem:[#allocation5 + $0xc8] sm:$0xff]  ;;  %v65_v4 = vld [vmem:[#allocation5 + $0x90] sm:$0xff]  ;;  %s271_s25 = sshll.u32 %s372_s24, 4  ;;  %vm264_vm0 = vcmask 254976   ;;  %s272_s25 = int_to_ptr.vmem [resolvable:$true] %s271_s25 }
   0xd   :  { %176 = vmatpush.xpose.msra.mxu3 %v74_v2  ;;  %136 = vmatpush.xpose.msra.mxu1 %v72_v3  ;;  %v63_v5 = vld [vmem:[#allocation5 + $0x80] sm:$0xff]  ;;  %v66_v6 = vld [vmem:[#allocation5 + $0x98] sm:$0xff]  ;;  %v64_v7 = vld [vmem:[#allocation5 + $0x88] sm:$0xff] }
   0xe   :  { %v57_v8 = vld [vmem:[#allocation5 + $0x50] sm:$0xff]  ;;  %v55_v9 = vld [vmem:[#allocation5 + $0x40] sm:$0xff]  ;;  %v58_v10 = vld [vmem:[#allocation5 + $0x58] sm:$0xff] }
   0xf   :  { %v56_v11 = vld [vmem:[#allocation5 + $0x48] sm:$0xff]  ;;  %v45_v12 = vld [vmem:[#allocation2] sm:$0xff]  ;;  %v47_v14 = vld [vmem:[#allocation5] sm:$0xff] }
  0x10   :  { %157 = vmatpush.xpose.msra.mxu2 %v65_v4  ;;  %117 = vmatpush.xpose.msra.mxu0 %v63_v5  ;;  %85 = vst [vmem:[#allocation1] ss:$4 sm:$0xff] %v45_v12  ;;  %v49_v13 = vld [vmem:[#allocation5 + $0x10] sm:$0xff]  ;;  %v46_v15 = vld [vmem:[#allocation2 + $0x8] sm:$0xff]  ;;  %v75_v18 = vld [vmem:[#allocation5 + $0xe0] sm:$0xff] }
  0x11   :  { %177 = vmatpush.xpose.msra.mxu3 %v66_v6  ;;  %137 = vmatpush.xpose.msra.mxu1 %v64_v7  ;;  %v77_v16 = vld [vmem:[#allocation5 + $0xf0] sm:$0xff]  ;;  %v50_v17 = vld [vmem:[#allocation5 + $0x18] sm:$0xff]  ;;  %87 = vst [vmem:[#allocation1 + $0x20] ss:$4 sm:$0xff] %v46_v15  ;;  %v48_v20 = vld [vmem:[#allocation5 + $0x8] sm:$0xff] }
  0x12   :  { %v78_v19 = vld [vmem:[#allocation5 + $0xf8] sm:$0xff]  ;;  %v76_v21 = vld [vmem:[#allocation5 + $0xe8] sm:$0xff]  ;;  %v69_v22 = vld [vmem:[#allocation5 + $0xb0] sm:$0xff] }
  0x13   :  { %v67_v25 = vld [vmem:[#allocation5 + $0xa0] sm:$0xff]  ;;  %v70_v26 = vld [vmem:[#allocation5 + $0xb8] sm:$0xff]  ;;  %v68_v29 = vld [vmem:[#allocation5 + $0xa8] sm:$0xff] }
  0x14   :  { %158 = vmatpush.xpose.msra.mxu2 %v57_v8  ;;  %118 = vmatpush.xpose.msra.mxu0 %v55_v9  ;;  %v61_v30 = vld [vmem:[#allocation5 + $0x70] sm:$0xff]  ;;  %v59_v31 = vld [vmem:[#allocation5 + $0x60] sm:$0xff]  ;;  %v62_v32 = vld [vmem:[#allocation5 + $0x78] sm:$0xff] }
  0x15   :  { %178 = vmatpush.xpose.msra.mxu3 %v58_v10  ;;  %138 = vmatpush.xpose.msra.mxu1 %v56_v11  ;;  %v60_v33 = vld [vmem:[#allocation5 + $0x68] sm:$0xff]  ;;  %v53_v34 = vld [vmem:[#allocation5 + $0x30] sm:$0xff]  ;;  %v51_v35 = vld [vmem:[#allocation5 + $0x20] sm:$0xff] }
  0x16   :  { %v54_v36 = vld [vmem:[#allocation5 + $0x38] sm:$0xff]  ;;  %v52_v38 = vld [vmem:[#allocation5 + $0x28] sm:$0xff] }
  0x17   :  { %v90_v23 = vld.sshfl [vmem:[#allocation1 + $0x10] sm:$0xff pattern:$0x73625140]  ;;  %v88_v24 = vld.sshfl [vmem:[#allocation1] sm:$0xff pattern:$0x73625140] }
  0x18   :  { %159 = vmatpush.xpose.msra.mxu2 %v49_v13  ;;  %119 = vmatpush.xpose.msra.mxu0 %v47_v14  ;;  %v91_v27 = vld.sshfl [vmem:[#allocation1 + $0x18] sm:$0xff pattern:$0x73625140]  ;;  %v89_v28 = vld.sshfl [vmem:[#allocation1 + $0x8] sm:$0xff pattern:$0x73625140] }
  0x19   :  { %179 = vmatpush.xpose.msra.mxu3 %v50_v17  ;;  %139 = vmatpush.xpose.msra.mxu1 %v48_v20  ;;  %v94_v37 = vld.sshfl [vmem:[#allocation1 + $0x30] sm:$0xff pattern:$0x73625140]  ;;  %v92_v39 = vld.sshfl [vmem:[#allocation1 + $0x20] sm:$0xff pattern:$0x73625140] }
  0x1a   :  { %v95_v40 = vld.sshfl [vmem:[#allocation1 + $0x38] sm:$0xff pattern:$0x73625140]  ;;  %v93_v41 = vld.sshfl [vmem:[#allocation1 + $0x28] sm:$0xff pattern:$0x73625140] }
  0x1b   :  { %160 = vmatmul.f32.vlgmr.msra.gmra.mxu2 %v90_v23  ;;  %120 = vmatmul.f32.vlgmr.msra.gmra.mxu0 %v88_v24  ;;  %v289_v42 = vld [vmem:[%s407_s2] ss:$0 sm:$0xff] }
  0x1c   :  { %236 = vmatpush.xpose.msrb.mxu2 %v77_v16  ;;  %196 = vmatpush.xpose.msrb.mxu0 %v75_v18 }
  0x1d   :  { %256 = vmatpush.xpose.msrb.mxu3 %v78_v19  ;;  %216 = vmatpush.xpose.msrb.mxu1 %v76_v21 }
  0x1e   :  { %180 = vmatmul.f32.vlgmr.msra.gmra.mxu3 %v91_v27  ;;  %140 = vmatmul.f32.vlgmr.msra.gmra.mxu1 %v89_v28 }
  0x20   :  { %237 = vmatpush.xpose.msrb.mxu2 %v69_v22  ;;  %197 = vmatpush.xpose.msrb.mxu0 %v67_v25 }
  0x21   :  { %257 = vmatpush.xpose.msrb.mxu3 %v70_v26  ;;  %217 = vmatpush.xpose.msrb.mxu1 %v68_v29 }
  0x24   :  { %238 = vmatpush.xpose.msrb.mxu2 %v61_v30  ;;  %198 = vmatpush.xpose.msrb.mxu0 %v59_v31 }
  0x25   :  { %258 = vmatpush.xpose.msrb.mxu3 %v62_v32  ;;  %218 = vmatpush.xpose.msrb.mxu1 %v60_v33 }
  0x28   :  { %239 = vmatpush.xpose.msrb.mxu2 %v53_v34  ;;  %199 = vmatpush.xpose.msrb.mxu0 %v51_v35 }
  0x29   :  { %259 = vmatpush.xpose.msrb.mxu3 %v54_v36  ;;  %219 = vmatpush.xpose.msrb.mxu1 %v52_v38 }
  0x2b   :  { %240 = vmatmul.f32.vlgmr.msrb.gmra.mxu2 %v94_v37  ;;  %200 = vmatmul.f32.vlgmr.msrb.gmra.mxu0 %v92_v39 }
  0x2c   :  { %260 = vmatmul.f32.vlgmr.msrb.gmra.mxu3 %v95_v40  ;;  %220 = vmatmul.f32.vlgmr.msrb.gmra.mxu1 %v93_v41 }
  0x98   :  { %v121_v43 = vpop.f32.mrf.mxu0 }
  0x99   :  { %v122_v44 = vadd.f32 %v289_v42, %v121_v43 }
  0x9b   :  { %v141_v45 = vpop.f32.mrf.mxu1 }
  0x9c   :  { %v142_v46 = vadd.f32 %v141_v45, %v122_v44 }
  0x9e   :  { %v161_v47 = vpop.f32.mrf.mxu2 }
  0x9f   :  { %v162_v48 = vadd.f32 %v161_v47, %v142_v46 }
  0xa1   :  { %v181_v49 = vpop.f32.mrf.mxu3 }
  0xa2   :  { %v182_v50 = vadd.f32 %v181_v49, %v162_v48 }
  0xa8   :  { %v201_v51 = vpop.f32.mrf.mxu0 }
  0xa9   :  { %v202_v52 = vadd.f32 %v201_v51, %v182_v50  ;;  %v221_v53 = vpop.f32.mrf.mxu1 }
  0xab   :  { %v222_v54 = vadd.f32 %v221_v53, %v202_v52 }
  0xae   :  { %v241_v55 = vpop.f32.mrf.mxu2 }
  0xaf   :  { %v242_v56 = vadd.f32 %v241_v55, %v222_v54  ;;  %v261_v57 = vpop.f32.mrf.mxu3 }
  0xb1   :  { %v262_v58 = vadd.f32 %v261_v57, %v242_v56 }
  0xb3   :  { %265 = vst.msk [vmem:[#allocation7] sm:$0x3] %vm264_vm0, %v262_v58 }
  0xb4   :  { %276 = dma.vmem_to_hbm [thread:$0]  %s272_s25, 32, %s274_s28, [#allocation4]  }
  0xb5   :  { %366 = dma.done.wait [#allocation4], 32  }
  0xb6   :  { %367 = vsyncadd [#allocation4], 4294967264 }
  0xb7   :  { %281 = vsyncpa [#allocation3], 1 }
  0xb8   :  { %282 = vsyncpa [#allocation6], 1 }
  0xb9   :  { %283 = vsyncpa [#allocation4], 1 }

</bundles_post_ra>
